<compile_context>
chip_gen: v6e
topology: v6e:2x2x1
jax: 0.10.0
libtpu: 0.0.40
codegen_flags: <defaults>
</compile_context>

<pallas_src>
import math
import functools

import jax
import jax.numpy as jnp
import numpy as np
from jax import lax
from jax.experimental import pallas as pl
from jax.experimental.pallas import tpu as pltpu


def _pick_tile(n, pref):
    """Largest divisor of n that is <= pref, preferring multiples of 128,
    then multiples of 8. Errors (rather than silently returning a huge block)
    if nothing reasonable exists."""
    if n <= pref:
        return n
    for step in (128, 8):
        start = (min(pref, n) // step) * step
        for t in range(start, step - 1, -step):
            if t > 0 and n % t == 0:
                return t
    if n <= 4096:
        return n
    raise ValueError(
        f"Cannot find a tile <= {pref} dividing dimension {n}; pad the "
        "sequence/batch to a multiple of 8 (ideally 128).")


# -----------------------------------------------------------------------------
# Stage 1: fused QKV projection.
#   [q | k | v] = x @ [wq*s | wk | wv] + [bq*s | bk | bv]
# emitted as three (B, T, C) outputs (no head transpose needed downstream).
# -----------------------------------------------------------------------------
def qkv_proj_kernel(x_ref, w_ref, b_ref, q_ref, k_ref, v_ref, *, C):
    x = x_ref[0].astype(w_ref.dtype)                        # (tm, C) MXU operand
    acc = jnp.dot(x, w_ref[...], preferred_element_type=jnp.float32)   # (tm, 3C)
    acc = acc + b_ref[...]                                  # bias add in f32
    q_ref[0] = acc[:, :C].astype(q_ref.dtype)
    k_ref[0] = acc[:, C:2 * C].astype(k_ref.dtype)
    v_ref[0] = acc[:, 2 * C:].astype(v_ref.dtype)


# -----------------------------------------------------------------------------
# Stage 2: flash attention (online softmax, all heads per step) + fused output
# projection.  Grid: (B, num_q_tiles, num_kv_tiles); kv axis innermost.
# -----------------------------------------------------------------------------
def flash_attn_out_kernel(q_ref, k_ref, v_ref, wo_ref, bo_ref, out_ref,
                          m_sc, l_sc, yacc_sc,
                          *, num_heads, head_dim, tq, tkv,
                          exp_dtype, approx_recip, compute_dtype):
    qi = pl.program_id(1)
    ki = pl.program_id(2)
    num_kv = pl.num_programs(2)

    # Reset per-(batch, q-tile) state once per kv sweep.
    @pl.when(ki == 0)
    def _():
        m_sc[...] = jnp.full_like(m_sc, -jnp.inf)
        l_sc[...] = jnp.zeros_like(l_sc)
        yacc_sc[...] = jnp.zeros_like(yacc_sc)

    row0 = qi * tq      # first query row of this tile
    col0 = ki * tkv     # first key column of this tile

    def flash_updates(causal_mask):
        # Static loop over heads; each head is a static lane slice of the
        # (tq, C) / (tkv, C) blocks and of the (tq, C) staging accumulator.
        for h in range(num_heads):
            c0 = h * head_dim
            c1 = c0 + head_dim
            qh = q_ref[0, :, c0:c1]                    # (tq, D), pre-scaled
            kh = k_ref[0, :, c0:c1]                    # (tkv, D)
            vh = v_ref[0, :, c0:c1]                    # (tkv, D)
            # NT matmul: contract last dims directly -> no explicit k transpose.
            s = lax.dot_general(qh, kh, (((1,), (1,)), ((), ())),
                                preferred_element_type=jnp.float32)  # (tq, tkv)
            if causal_mask is not None:
                s = jnp.where(causal_mask, s, -jnp.inf)
            m_prev = m_sc[:, h:h + 1]                                  # (tq, 1)
            m_new = jnp.maximum(m_prev, s.max(axis=-1, keepdims=True))
            alpha = jnp.exp(m_prev - m_new)            # tiny, stays f32
            # Big exponent in exp_dtype (bf16 on v6e/v7x; f32 on v5e); row sums
            # and the numerator accumulate in f32.
            p = jnp.exp((s - m_new).astype(exp_dtype))                 # (tq, tkv)
            l_sc[:, h:h + 1] = alpha * l_sc[:, h:h + 1] + jnp.sum(
                p, axis=-1, keepdims=True, dtype=jnp.float32)
            pv = jnp.dot(p.astype(vh.dtype), vh,
                         preferred_element_type=jnp.float32)           # (tq, D)
            yacc_sc[:, c0:c1] = alpha * yacc_sc[:, c0:c1] + pv
            m_sc[:, h:h + 1] = m_new

    # Interior tiles (entirely below the diagonal): no causal mask needed.
    @pl.when(col0 + (tkv - 1) <= row0)
    def _():
        flash_updates(None)

    # Diagonal-straddling tiles: build the mask once, shared across heads.
    @pl.when(jnp.logical_and(col0 <= row0 + (tq - 1), col0 + (tkv - 1) > row0))
    def _():
        rows = row0 + lax.broadcasted_iota(jnp.int32, (tq, tkv), 0)
        cols = col0 + lax.broadcasted_iota(jnp.int32, (tq, tkv), 1)
        flash_updates(cols <= rows)

    # Tiles fully above the diagonal run neither branch; their k/v DMA is also
    # elided because the kv index_map clamps the block index (see wrapper).

    # Finalize: normalize each head's lane slice, then ONE (tq, C) @ (C, C)
    # output projection (full systolic-depth fill) and a lane-dense store.
    @pl.when(ki == num_kv - 1)
    def _():
        for h in range(num_heads):
            c0 = h * head_dim
            c1 = c0 + head_dim
            inv = pl.reciprocal(l_sc[:, h:h + 1], approx=approx_recip)
            yacc_sc[:, c0:c1] = yacc_sc[:, c0:c1] * inv
        y = yacc_sc[...].astype(compute_dtype)                          # (tq, C)
        out = jnp.dot(y, wo_ref[...], preferred_element_type=jnp.float32)
        out_ref[0] = (out + bo_ref[...]).astype(out_ref.dtype)


# -----------------------------------------------------------------------------
# Wrapper
# -----------------------------------------------------------------------------
def causal_self_attention(x, wq, wk, wv, wo, bq, bk, bv, bo, *, num_heads,
                          compute_dtype=jnp.bfloat16, softmax_exp_dtype=None,
                          q_tile=512, kv_tile=512, proj_tile=512):
    """x: (B, T, C) in any float dtype (kept at the boundary, no forced f32);
    weights (C, C) in (in, out) layout (= PyTorch W.T); biases (1, C).
    softmax_exp_dtype: dtype for the big softmax exp (default: compute_dtype;
    pass jnp.float32 on v5e which has no bf16 EUP)."""
    B, T, C = x.shape
    H = num_heads
    assert C % H == 0
    D = C // H
    out_dtype = x.dtype
    approx = jnp.dtype(compute_dtype) != jnp.dtype(jnp.float32)
    exp_dtype = compute_dtype if softmax_exp_dtype is None else softmax_exp_dtype

    # Fold the 1/sqrt(D) attention scale into the q projection (free, host-side)
    # and fuse the three projections into one (C, 3C) weight / (1, 3C) bias.
    scale = 1.0 / math.sqrt(D)
    wqkv = jnp.concatenate([wq * scale, wk, wv], axis=1).astype(compute_dtype)
    bqkv = jnp.concatenate([bq * scale, bk, bv], axis=1).astype(jnp.float32)
    wo_c = wo.astype(compute_dtype)
    bo_f = bo.astype(jnp.float32)
    # NOTE(v7x): for C >= ~2048 the resident (C, 3C) weight should be tiled
    # along its output axis (extra grid dim) to respect the 64 MiB VMEM; and the
    # constant-index weight/bias blocks could use pipeline_mode=pl.Buffered(1).

    # ---- Stage 1: fused QKV projection, outputs q/k/v in (B, T, C) ----------
    tm = _pick_tile(T, proj_tile)
    nT = T // tm
    q, k, v = pl.pallas_call(
        functools.partial(qkv_proj_kernel, C=C),
        out_shape=(jax.ShapeDtypeStruct((B, T, C), compute_dtype),
                   jax.ShapeDtypeStruct((B, T, C), compute_dtype),
                   jax.ShapeDtypeStruct((B, T, C), compute_dtype)),
        grid_spec=pltpu.PrefetchScalarGridSpec(
            num_scalar_prefetch=0,
            grid=(B, nT),
            in_specs=[
                pl.BlockSpec((1, tm, C), lambda b, i: (b, i, 0)),       # x
                pl.BlockSpec((C, 3 * C), lambda b, i: (0, 0)),          # wqkv
                pl.BlockSpec((1, 3 * C), lambda b, i: (0, 0)),          # bqkv
            ],
            out_specs=[
                pl.BlockSpec((1, tm, C), lambda b, i: (b, i, 0)),       # q
                pl.BlockSpec((1, tm, C), lambda b, i: (b, i, 0)),       # k
                pl.BlockSpec((1, tm, C), lambda b, i: (b, i, 0)),       # v
            ],
        ),
        compiler_params=pltpu.CompilerParams(
            dimension_semantics=("parallel", "parallel"),
            vmem_limit_bytes=64 * 1024 * 1024),
    )(x, wqkv, bqkv)

    # ---- Stage 2: flash attention + fused output projection ------------------
    tq = _pick_tile(T, q_tile)
    tkv = _pick_tile(T, kv_tile)
    # Keep >= 2 parallel grid slices so both TensorCores get work (v7x).
    if B * (T // tq) < 2:
        smaller = _pick_tile(T, max(8, tq // 2))
        if T // smaller >= 2:
            tq = smaller
    nq, nkv = T // tq, T // tkv

    def q_map(b, qi, ki):
        return (b, qi, 0)

    def kv_map(b, qi, ki):
        # Clamp to the last causally-needed KV tile: fully-masked tiles repeat
        # the previous block index, so Pallas skips their DMA entirely.
        return (b, jnp.minimum(ki, (qi * tq + tq - 1) // tkv), 0)

    kernel = functools.partial(
        flash_attn_out_kernel, num_heads=H, head_dim=D, tq=tq, tkv=tkv,
        exp_dtype=exp_dtype, approx_recip=approx, compute_dtype=compute_dtype)

    out = pl.pallas_call(
        kernel,
        out_shape=jax.ShapeDtypeStruct((B, T, C), out_dtype),
        grid_spec=pltpu.PrefetchScalarGridSpec(
            num_scalar_prefetch=0,
            grid=(B, nq, nkv),
            in_specs=[
                pl.BlockSpec((1, tq, C), q_map),                        # q (all heads)
                pl.BlockSpec((1, tkv, C), kv_map),                      # k (all heads)
                pl.BlockSpec((1, tkv, C), kv_map),                      # v (all heads)
                pl.BlockSpec((C, C), lambda b, qi, ki: (0, 0)),         # wo (resident)
                pl.BlockSpec((1, C), lambda b, qi, ki: (0, 0)),         # bo
            ],
            out_specs=pl.BlockSpec((1, tq, C), lambda b, qi, ki: (b, qi, 0)),
            scratch_shapes=[
                pltpu.VMEM((tq, H), jnp.float32),   # running max (per head column)
                pltpu.VMEM((tq, H), jnp.float32),   # running denominator
                pltpu.VMEM((tq, C), jnp.float32),   # per-head numerators, staged for
                                                    # the single K=C output matmul
            ],
        ),
        compiler_params=pltpu.CompilerParams(
            dimension_semantics=("parallel", "parallel", "arbitrary"),
            vmem_limit_bytes=64 * 1024 * 1024),
    )(q, k, v, wo_c, bo_f)
    return out


# -----------------------------------------------------------------------------
# Pure-JAX reference (mirrors the PyTorch module)
# -----------------------------------------------------------------------------
def reference_attention(x, wq, wk, wv, wo, bq, bk, bv, bo, *, num_heads):
    B, T, C = x.shape
    D = C // num_heads
    q = x @ wq + bq
    k = x @ wk + bk
    v = x @ wv + bv
    q = q.reshape(B, T, num_heads, D).transpose(0, 2, 1, 3)
    k = k.reshape(B, T, num_heads, D).transpose(0, 2, 1, 3)
    v = v.reshape(B, T, num_heads, D).transpose(0, 2, 1, 3)
    att = jnp.einsum('bhtd,bhsd->bhts', q, k) / math.sqrt(D)
    mask = jnp.tril(jnp.ones((T, T), dtype=bool))
    att = jnp.where(mask, att, -jnp.inf)
    att = jax.nn.softmax(att, axis=-1)
    y = jnp.einsum('bhts,bhsd->bhtd', att, v)
    y = y.transpose(0, 2, 1, 3).reshape(B, T, C)
    return y @ wo + bo


if __name__ == "__main__":
    # Small config consistent with the module: embd_dim=32, num_heads=4, seq=8, batch=2
    B, T, C, H = 2, 8, 32, 4

    key = jax.random.PRNGKey(0)
    kx, kq, kk, kv, ko, kbq, kbk, kbv, kbo = jax.random.split(key, 9)

    x = jax.random.normal(kx, (B, T, C), dtype=jnp.float32)
    # Weights stored as (in, out): equivalent to PyTorch W.T
    wq = 0.02 * jax.random.normal(kq, (C, C), dtype=jnp.float32)
    wk = 0.02 * jax.random.normal(kk, (C, C), dtype=jnp.float32)
    wv = 0.02 * jax.random.normal(kv, (C, C), dtype=jnp.float32)
    wo = 0.02 * jax.random.normal(ko, (C, C), dtype=jnp.float32)
    bq = 0.02 * jax.random.normal(kbq, (1, C), dtype=jnp.float32)
    bk = 0.02 * jax.random.normal(kbk, (1, C), dtype=jnp.float32)
    bv = 0.02 * jax.random.normal(kbv, (1, C), dtype=jnp.float32)
    bo = 0.02 * jax.random.normal(kbo, (1, C), dtype=jnp.float32)

    ref = reference_attention(x, wq, wk, wv, wo, bq, bk, bv, bo, num_heads=H)

    # Precise path (f32 MXU operands, f32 exp, exact reciprocal): tight check.
    out_f32 = causal_self_attention(x, wq, wk, wv, wo, bq, bk, bv, bo,
                                    num_heads=H, compute_dtype=jnp.float32)
    out_f32 = jax.block_until_ready(out_f32)
    np.testing.assert_allclose(np.asarray(out_f32), np.asarray(ref),
                               rtol=1e-5, atol=1e-5)

    # Performance path (bf16 MXU operands + bf16 exp, f32 accumulation): looser.
    out_bf16 = causal_self_attention(x, wq, wk, wv, wo, bq, bk, bv, bo,
                                     num_heads=H)
    out_bf16 = jax.block_until_ready(out_bf16)
    np.testing.assert_allclose(np.asarray(out_bf16), np.asarray(ref),
                               rtol=2e-2, atol=2e-2)

    print("KERNEL_OK")
</pallas_src>

<mosaic_0001>
module attributes {stable_mosaic.version = 11 : i64} {
  func.func @qkv_proj_kernel(%arg0: i32, %arg1: i32, %arg2: memref<1x8x32xf32, #tpu.memory_space<vmem>>, %arg3: memref<32x96xf32, #tpu.memory_space<vmem>>, %arg4: memref<1x96xf32, #tpu.memory_space<vmem>>, %arg5: memref<1x8x32xf32, #tpu.memory_space<vmem>>, %arg6: memref<1x8x32xf32, #tpu.memory_space<vmem>>, %arg7: memref<1x8x32xf32, #tpu.memory_space<vmem>>) attributes {dimension_semantics = [#tpu.dimension_semantics<parallel>, #tpu.dimension_semantics<parallel>], iteration_bounds = array<i64: 2, 1>, scalar_prefetch = 0 : i64, scratch_operands = 0 : i64, tpu.core_type = #tpu.core_type<tc>, window_params = [{transform_indices = @transform_0, window_bounds = array<i64: 1, 8, 32>}, {pipeline_mode = #tpu.pipeline_mode<synchronous>, transform_indices = @transform_1, window_bounds = array<i64: 32, 96>}, {pipeline_mode = #tpu.pipeline_mode<synchronous>, transform_indices = @transform_2, window_bounds = array<i64: 1, 96>}, {transform_indices = @transform_3, window_bounds = array<i64: 1, 8, 32>}, {transform_indices = @transform_4, window_bounds = array<i64: 1, 8, 32>}, {transform_indices = @transform_5, window_bounds = array<i64: 1, 8, 32>}]} {
    %c0 = arith.constant 0 : index
    %c0_0 = arith.constant 0 : index
    %c0_1 = arith.constant 0 : index
    %0 = vector.load %arg2[%c0, %c0_0, %c0_1] : memref<1x8x32xf32, #tpu.memory_space<vmem>>, vector<1x8x32xf32>
    %1 = vector.shape_cast %0 : vector<1x8x32xf32> to vector<8x32xf32>
    %c0_2 = arith.constant 0 : index
    %c0_3 = arith.constant 0 : index
    %2 = vector.load %arg3[%c0_2, %c0_3] : memref<32x96xf32, #tpu.memory_space<vmem>>, vector<32x96xf32>
    %cst = arith.constant dense<0.000000e+00> : vector<8x96xf32>
    %3 = tpu.matmul %1, %2, %cst {dimension_numbers = #tpu.dot_dimension_numbers<[1], [0], [0], [1], [0, 0, 1, 1], [], []>} : vector<8x32xf32>, vector<32x96xf32>, vector<8x96xf32> -> vector<8x96xf32>
    %c0_4 = arith.constant 0 : index
    %c0_5 = arith.constant 0 : index
    %4 = vector.load %arg4[%c0_4, %c0_5] : memref<1x96xf32, #tpu.memory_space<vmem>>, vector<1x96xf32>
    %5 = vector.broadcast %4 : vector<1x96xf32> to vector<8x96xf32>
    %6 = arith.addf %3, %5 : vector<8x96xf32>
    %7 = vector.extract_strided_slice %6 {offsets = [0, 0], sizes = [8, 32], strides = [1, 1]} : vector<8x96xf32> to vector<8x32xf32>
    %c0_6 = arith.constant 0 : index
    %c0_7 = arith.constant 0 : index
    %c0_8 = arith.constant 0 : index
    %8 = vector.load %arg5[%c0_6, %c0_7, %c0_8] : memref<1x8x32xf32, #tpu.memory_space<vmem>>, vector<1x8x32xf32>
    %9 = vector.shape_cast %8 : vector<1x8x32xf32> to vector<8x32xf32>
    %10 = vector.shape_cast %7 : vector<8x32xf32> to vector<1x8x32xf32>
    tpu.vector_store %arg5[%c0_6, %c0_7, %c0_8], %10 {strides = array<i32>} : memref<1x8x32xf32, #tpu.memory_space<vmem>>, vector<1x8x32xf32>,
    %11 = vector.extract_strided_slice %6 {offsets = [0, 32], sizes = [8, 32], strides = [1, 1]} : vector<8x96xf32> to vector<8x32xf32>
    %c0_9 = arith.constant 0 : index
    %c0_10 = arith.constant 0 : index
    %c0_11 = arith.constant 0 : index
    %12 = vector.load %arg6[%c0_9, %c0_10, %c0_11] : memref<1x8x32xf32, #tpu.memory_space<vmem>>, vector<1x8x32xf32>
    %13 = vector.shape_cast %12 : vector<1x8x32xf32> to vector<8x32xf32>
    %14 = vector.shape_cast %11 : vector<8x32xf32> to vector<1x8x32xf32>
    tpu.vector_store %arg6[%c0_9, %c0_10, %c0_11], %14 {strides = array<i32>} : memref<1x8x32xf32, #tpu.memory_space<vmem>>, vector<1x8x32xf32>,
    %15 = vector.extract_strided_slice %6 {offsets = [0, 64], sizes = [8, 32], strides = [1, 1]} : vector<8x96xf32> to vector<8x32xf32>
    %c0_12 = arith.constant 0 : index
    %c0_13 = arith.constant 0 : index
    %c0_14 = arith.constant 0 : index
    %16 = vector.load %arg7[%c0_12, %c0_13, %c0_14] : memref<1x8x32xf32, #tpu.memory_space<vmem>>, vector<1x8x32xf32>
    %17 = vector.shape_cast %16 : vector<1x8x32xf32> to vector<8x32xf32>
    %18 = vector.shape_cast %15 : vector<8x32xf32> to vector<1x8x32xf32>
    tpu.vector_store %arg7[%c0_12, %c0_13, %c0_14], %18 {strides = array<i32>} : memref<1x8x32xf32, #tpu.memory_space<vmem>>, vector<1x8x32xf32>,
    return
  }
  func.func @transform_0(%arg0: i32, %arg1: i32) -> (i32, i32, i32) {
    %c0_i32 = arith.constant 0 : i32
    %c0_i32_0 = arith.constant 0 : i32
    return %arg0, %arg1, %c0_i32 : i32, i32, i32
  }
  func.func @transform_1(%arg0: i32, %arg1: i32) -> (i32, i32) {
    %c0_i32 = arith.constant 0 : i32
    %c0_i32_0 = arith.constant 0 : i32
    %c0_i32_1 = arith.constant 0 : i32
    return %c0_i32, %c0_i32_0 : i32, i32
  }
  func.func @transform_2(%arg0: i32, %arg1: i32) -> (i32, i32) {
    %c0_i32 = arith.constant 0 : i32
    %c0_i32_0 = arith.constant 0 : i32
    %c0_i32_1 = arith.constant 0 : i32
    return %c0_i32, %c0_i32_0 : i32, i32
  }
  func.func @transform_3(%arg0: i32, %arg1: i32) -> (i32, i32, i32) {
    %c0_i32 = arith.constant 0 : i32
    %c0_i32_0 = arith.constant 0 : i32
    return %arg0, %arg1, %c0_i32 : i32, i32, i32
  }
  func.func @transform_4(%arg0: i32, %arg1: i32) -> (i32, i32, i32) {
    %c0_i32 = arith.constant 0 : i32
    %c0_i32_0 = arith.constant 0 : i32
    return %arg0, %arg1, %c0_i32 : i32, i32, i32
  }
  func.func @transform_5(%arg0: i32, %arg1: i32) -> (i32, i32, i32) {
    %c0_i32 = arith.constant 0 : i32
    %c0_i32_0 = arith.constant 0 : i32
    return %arg0, %arg1, %c0_i32 : i32, i32, i32
  }
}

</mosaic_0001>

<bundles_post_ra>
// kernel: tpu_custom_call.1
= control target key start
LH: loop header
LB: loop body
LE: loop exit
PB: predicated region body
PF: predicated region fallthrough
CT: control target
= control target key end

     0   :  { %s1209_s0 = inlined_call_operand.hbm [shape: f32[2,8,32], index: 0, kind: input, shape index: {}]   ;;  %s1210_s1 = inlined_call_operand.hbm [shape: f32[32,96], index: 1, kind: input, shape index: {}]   ;;  %s1211_s2 = inlined_call_operand.vmem [shape: f32[1,96], index: 2, kind: input, shape index: {}]   ;;  %s1212_s3 = inlined_call_operand.hbm [shape: f32[2,8,32], index: 3, kind: output, shape index: {0}]   ;;  %s1213_s4 = inlined_call_operand.hbm [shape: f32[2,8,32], index: 4, kind: output, shape index: {1}]   ;;  %s1214_s5 = inlined_call_operand.hbm [shape: f32[2,8,32], index: 5, kind: output, shape index: {2}]  }
   0x1   :  { %1218 = sst [smem:[#allocation16_spill]] %s1210_s1 }
   0x2   :  { %11 = vsyncpa [#allocation3], 0 }
   0x3   :  { %13 = vsyncpa [#allocation3 + $0x1], 0 }
   0x4   :  { %14 = vsyncpa [#allocation6], 0 }
   0x5   :  { %15 = vsyncpa [#allocation4], 0 }
   0x6   :  { %17 = vsyncpa [#allocation4 + $0x1], 0 }
   0x7   :  { %18 = vsyncpa [#allocation9], 0 }
   0x8   :  { %20 = vsyncpa [#allocation9 + $0x1], 0  ;;  %s961_s18 = smov 0   ;;  %s963_s19 = smov 0  }
   0x9   :  { %s965_s20 = smov 0   ;;  %s967_s21 = smov 0  }
   0xa   :  { %s969_s22 = smov 0   ;;  %s971_s23 = smov 0  }
   0xb LB: > { %s992_s24 = sadd.s32 4294967295, %s918_s23   ;;  %s1215_s25 = sadd.s32 4294967294, %s918_s23   ;;  %s918_s23 = sphi %s971_s23, %s26_s23   ;;  %s914_s22 = sphi %s969_s22, %s1239_s22   ;;  %s910_s21 = sphi %s967_s21, %s1238_s21   ;;  %s906_s20 = sphi %s965_s20, %s1237_s20   ;;  %s902_s19 = sphi %s963_s19, %s1236_s19   ;;  %s898_s18 = sphi %s961_s18, %s1235_s18  }
   0xc   : > { %p60_p0 = scmp.ne.s32.totalorder %s902_s19, %s898_s18  ;;  %p1217_p1 = scmp.eq.s32.totalorder %s992_s24, 0 }
   0xd   : > { %p134_p3 = scmp.eq.s32.totalorder %s1215_s25, 1  ;;  %p598_p5 = scmp.ge.s32.totalorder %s918_s23, 1 }
   0xe   : > { %p1003_p4 = por %p1217_p1, %p60_p0  ;;  %p197_p7 = scmp.lt.s32.totalorder %s918_s23, 3 }
   0xf   : > { %p1008_p6 = por %p134_p3, %p60_p0  ;;  %s920_s29 = smov [#allocation5]  }
  0x10   : > { %p1013_p8 = pnand %p598_p5, %p197_p7  ;;  %s209_s30 = sshll.u32 %s920_s29, 4  ;;  %s210_s30 = int_to_ptr.vmem [resolvable:$true] %s209_s30 }
  0x11   : > { %s1220_s27 = scalar_select %p1008_p6, 1, 0 }
  0x12   : > { %p647_p9 = pneg %p1013_p8  ;;  %s38_s7 = sadd.s32 1, %s914_s22 }
  0x13   : > { %s735_s8 = scalar_lea.vmem %s210_s30, 512  ;;  %p743_p5 = scmp.lt.s32.totalorder %s210_s30, %s210_s30 }
  0x14   : > { %p1022_p11 = pnand %p647_p9, %p1217_p1  ;;  %p736_p13 = scmp.ne.s32.totalorder %s210_s30, %s735_s8 }
  0x15   : > { %p744_p7 = scmp.lt.s32.totalorder %s735_s8, %s735_s8 }
  0x16   : > { %p726_p12 = pneg %p1022_p11 }
  0x17   : > { %p745_p2 = por %p744_p7, %p743_p5 }
  0x18   : > { %p738_p0 = pnand %p736_p13, %p726_p12 }
  0x1a   : > { %p739_p3 = pneg %p738_p0 }
  0x1c   : > { %p746_p6 = pnand %p745_p2, %p739_p3 }
  0x1e   : > { %749 = shalt.err (!%p746_p6)
}
  0x1f   : > { %s921_s9 = smov 128   ;;  %s922_s10 = smov 8  }
  0x20   : > { %s1223_s1 = sld [smem:[#allocation16_spill]]  ;;  %p40_p2 = scmp.ge.s32.totalorder %s38_s7, 2 }
  0x21   : > { %s47_s13 = sadd.s32 1, %s906_s20  ;;  %p54_p6 = scmp.ne.s32.totalorder %s906_s20, %s902_s19 }
  0x22   : > { %p55_p9 = scmp.eq.s32.totalorder %s918_s23, 0  ;;  %s1241_s7 = smov (%p40_p2, %s38_s7), 0 }
  0x23   : > { %1224 = sst [smem:[#allocation15_spill]] %s1241_s7  ;;  %p1226_p13 = scmp.eq.s32.totalorder %s992_s24, 1 }
  0x24   : > { %p1040_p12 = por %p55_p9, %p54_p6  ;;  %s42_s16 = ssub.s32 %s914_s22, %s1241_s7 }
  0x25   : > { %p1046_p0 = por %p1226_p13, %p54_p6  ;;  %p666_p3 = scmp.lt.s32.totalorder %s918_s23, 2 }
  0x26   : > { %650 = dma.hbm_to_vmem [thread:$0]  (!%p1022_p11), %s1223_s1, 512, %s210_s30, [#allocation6], %s921_s9, %s921_s9, %s922_s10  }
  0x27   : > { %p45_p11 = scmp.eq.s32.totalorder %s42_s16, 0  ;;  %s226_s17 = sand.u32 1, %s906_s20  }
  0x28   : > { %s601_s29 = sshll.u32 %s226_s17, 3  ;;  %s602_s6 = sshll.u32 %s914_s22, 7 }
  0x29   : > { %s1055_s30 = scalar_select %p45_p11, %s906_s20, %s47_s13  }
  0x2a   : > { %s236_s10 = scalar_lea.hbm %s1209_s0, %s602_s6  ;;  %s230_s11 = scalar_lea.vmem [#allocation2], %s601_s29 }
  0x2b   : > { %s238_s12 = sshll.u32 %s230_s11, 4  ;;  %p1063_p5 = pnand %p666_p3, %p1040_p12  ;;  %s239_s12 = int_to_ptr.vmem [resolvable:$true] %s238_s12 }
  0x2c   : > { %s227_s1 = scalar_lea.sflag [#allocation3], %s226_s17  ;;  %s763_s16 = scalar_lea.vmem %s239_s12, 128 }
  0x2d   : > { %p752_p7 = pneg %p1063_p5  ;;  %p764_p2 = scmp.ne.s32.totalorder %s239_s12, %s763_s16 }
  0x2e   : > { %s923_s13 = smov [#allocation2]  }
  0x2f   : > { %p766_p6 = pnand %p764_p2, %p752_p7  ;;  %s768_s7 = sshll.u32 %s923_s13, 4  ;;  %s769_s7 = int_to_ptr.vmem [resolvable:$false] %s768_s7 }
  0x30   : > { %s770_s6 = scalar_lea.vmem %s769_s7, 256  ;;  %p771_p13 = scmp.lt.s32.totalorder %s239_s12, %s769_s7 }
  0x31   : > { %p767_p9 = pneg %p766_p6  ;;  %p772_p11 = scmp.lt.s32.totalorder %s770_s6, %s763_s16 }
  0x33   : > { %p773_p10 = por %p772_p11, %p771_p13 }
  0x35   : > { %p774_p1 = pnand %p773_p10, %p767_p9 }
  0x37   : > { %777 = shalt.err (!%p774_p1)
}
  0x38   : > { %654 = dma.hbm_to_vmem [thread:$0]  (!%p1063_p5), %s236_s10, 128, %s239_s12, %s227_s1  }
  0x39   : > { %247 = sbr.rel (%p1013_p8) target bundleno = 420 (0x1a4), region = 32  ;;  %s1074_s14 = sand.u32 (!%p1013_p8), 1, %s902_s19  }
  0x3a   : > { %s1077_s17 = sshll.u32 (!%p1013_p8), %s1074_s14, 3  ;;  %s250_s7 = scalar_lea.sflag (!%p1013_p8), [#allocation3], %s1074_s14 }
  0x3b   : > { %s253_s29 = scalar_lea.vmem (!%p1013_p8), [#allocation2], %s1077_s17 }
  0x3e   : > { %881 = dma.done.wait (%p1003_p4), %s250_s7, 128  }
  0x3f   : > { %883 = vsyncadd (%p1003_p4), %s250_s7, 4294967168  ;;  %p1229_p1 = scmp.eq.s32.totalorder %s992_s24, 0 }
  0x41   : > { %885 = dma.done.wait (%p1229_p1), [#allocation6], 512   ;;  %p1230_p8 = pmov %p1229_p1 }
  0x42   : > { %v924_v0 = vmov 0.0   ;;  %vm925_vm0 = vmmov 0   ;;  %v298_v1 = vld [vmem:[#allocation5 + $0x18] sm:$0xff]  ;;  %v297_v2 = vld [vmem:[#allocation5 + $0x10] sm:$0xff]  ;;  %v296_v3 = vld [vmem:[#allocation5 + $0x8] sm:$0xff]  ;;  %vm306_vm1 = vcmask 261120  }
  0x43   : > { %887 = vsyncadd (%p1230_p8), [#allocation6], 4294966784  ;;  %624 = vmatprep.subr.mxu0 %v924_v0  ;;  %632 = vmatprep.mubr.msk.f32.mxu0 %vm925_vm0, %v924_v0  ;;  %v295_v4 = vld [vmem:[#allocation5] sm:$0xff]  ;;  %v294_v5 = vld [vmem:[%s253_s29] sm:$0xff]  ;;  %s1094_s26 = sshll.u32 %s910_s21, 7  ;;  %s279_s28 = scalar_lea.vmem [#allocation7], %s1077_s17 }
  0x44   : > { %625 = vmatpush3.msra.mxu0 %v298_v1  ;;  %v609_v6 = vld [vmem:[%s1211_s2] ss:$0 sm:$0xff]  ;;  %s415_s8 = sshll.u32 %s279_s28, 4  ;;  %s1101_s11 = scalar_lea.hbm %s1212_s3, %s1094_s26  ;;  %s1103_s8 = int_to_ptr.vmem [resolvable:$true] %s415_s8 }
  0x45   : > { %626 = vmatprep.subr.mxu0 %v924_v0  ;;  %s926_s12 = smov 96   ;;  %s391_s21 = scalar_lea.sflag [#allocation4], %s1074_s14 }
  0x46   : > { %627 = vmatpush3.msra.mxu0 %v297_v2  ;;  %s778_s16 = scalar_lea.vmem %s1103_s8, 128  ;;  %s927_s13 = smov [#allocation7]  }
  0x47   : > { %628 = vmatprep.subr.mxu0 %v924_v0  ;;  %p779_p4 = scmp.ne.s32.totalorder %s1103_s8, %s778_s16  ;;  %s782_s6 = sshll.u32 %s927_s13, 4  ;;  %s783_s6 = int_to_ptr.vmem [resolvable:$false] %s782_s6 }
  0x48   : > { %629 = vmatpush3.msra.mxu0 %v296_v3  ;;  %s784_s7 = scalar_lea.vmem %s783_s6, 256  ;;  %p785_p3 = scmp.lt.s32.totalorder %s1103_s8, %s783_s6 }
  0x49   : > { %630 = vmatprep.subr.mxu0 %v924_v0  ;;  %p780_p10 = pnand %p779_p4, %p1046_p0  ;;  %p786_p5 = scmp.lt.s32.totalorder %s784_s7, %s778_s16 }
  0x4a   : > { %631 = vmatpush3.msra.mxu0 %v295_v4 }
  0x4b   : > { %633 = vmatmul.mubr.msk.f32.vlgmr.msra.gmra.mxu0 %vm306_vm1, %v294_v5  ;;  %p781_p12 = pneg %p780_p10  ;;  %p787_p7 = por %p786_p5, %p785_p3 }
  0x4d   : > { %p788_p2 = pnand %p787_p7, %p781_p12 }
 0x10b   : > { %v376_v7 = vpop.f32.mrf.mxu0 }
 0x10c   : > { %v377_v8 = vadd.f32 %v609_v6, %v376_v7 }
 0x10d   : > { %v634_v9 = vpop.f32.mrf.mxu0 }
 0x10e   : > { %382 = vrot.lane.b32.xlu0 %v377_v8, %s926_s12  ;;  %380 = vst.msk [vmem:[%s279_s28] sm:$0xff] %vm306_vm1, %v377_v8 }
 0x10f   : > { %791 = shalt.err (!%p788_p2)
}
 0x110   : > { %s792_s29 = scalar_lea.hbm %s1101_s11, 128  ;;  %s796_s25 = scalar_lea.hbm %s1212_s3, 256 }
 0x111   : > { %p793_p6 = scmp.ne.s32.totalorder %s1101_s11, %s792_s29  ;;  %p797_p11 = scmp.lt.s32.totalorder %s1101_s11, %s1212_s3 }
 0x112   : > { %p798_p1 = scmp.lt.s32.totalorder %s796_s25, %s792_s29 }
 0x113   : > { %p794_p9 = pnand %p793_p6, %p1046_p0 }
 0x114   : > { %p799_p8 = por %p798_p1, %p797_p11 }
 0x115   : > { %p795_p13 = pneg %p794_p9 }
 0x117   : > { %p800_p4 = pnand %p799_p8, %p795_p13 }
 0x119   : > { %803 = shalt.err (!%p800_p4)
}
 0x11a   : > { %641 = dma.vmem_to_hbm [thread:$0]  (%p1046_p0), %s1103_s8, 128, %s1101_s11, %s391_s21  }
 0x11b   : > { %s928_s10 = smov 64   ;;  %s395_s12 = sand.u32 1, %s992_s24  }
 0x11c   : > { %386 = vrot.lane.b32.xlu0 %v377_v8, %s928_s10  ;;  %s286_s16 = scalar_lea.vmem [#allocation8], %s1077_s17  ;;  %s1133_s29 = scalar_lea.hbm %s1213_s4, %s1094_s26 }
 0x11d   : > { %s429_s13 = sshll.u32 %s286_s16, 4  ;;  %s293_s14 = scalar_lea.vmem [#allocation10], %s1077_s17  ;;  %s1135_s13 = int_to_ptr.vmem [resolvable:$true] %s429_s13 }
 0x11e   : > { %s443_s1 = sshll.u32 %s293_s14, 4  ;;  %s1141_s8 = scalar_lea.sflag [#allocation9], %s395_s12  ;;  %s444_s1 = int_to_ptr.vmem [resolvable:$true] %s443_s1 }
 0x11f   : > { %s804_s24 = scalar_lea.vmem %s1135_s13, 128  ;;  %s929_s11 = smov [#allocation8]  }
 0x120   : > { %p805_p10 = scmp.ne.s32.totalorder %s1135_s13, %s804_s24  ;;  %s808_s21 = sshll.u32 %s929_s11, 4  ;;  %s809_s21 = int_to_ptr.vmem [resolvable:$false] %s808_s21 }
 0x121   : > { %s810_s25 = scalar_lea.vmem %s809_s21, 256  ;;  %p811_p5 = scmp.lt.s32.totalorder %s1135_s13, %s809_s21 }
 0x122   : > { %p806_p12 = pnand %p805_p10, %p1046_p0  ;;  %p812_p7 = scmp.lt.s32.totalorder %s810_s25, %s804_s24 }
 0x124   : > { %p807_p3 = pneg %p806_p12  ;;  %p813_p2 = por %p812_p7, %p811_p5 }
 0x126   : > { %p814_p6 = pnand %p813_p2, %p807_p3 }
 0x180   : > { %v383_v10 = vpop.permute.xlu0 %382 }
 0x181   : > { %385 = vst.msk [vmem:[%s286_s16] sm:$0xff] %vm306_vm1, %v383_v10 }
 0x182   : > { %817 = shalt.err (!%p814_p6)
}
 0x183   : > { %s818_s28 = scalar_lea.hbm %s1133_s29, 128  ;;  %s822_s12 = scalar_lea.hbm %s1213_s4, 256 }
 0x184   : > { %p819_p9 = scmp.ne.s32.totalorder %s1133_s29, %s818_s28  ;;  %p823_p1 = scmp.lt.s32.totalorder %s1133_s29, %s1213_s4 }
 0x185   : > { %p824_p8 = scmp.lt.s32.totalorder %s822_s12, %s818_s28 }
 0x186   : > { %p820_p13 = pnand %p819_p9, %p1046_p0 }
 0x187   : > { %p825_p4 = por %p824_p8, %p823_p1 }
 0x188   : > { %p821_p11 = pneg %p820_p13 }
 0x18a   : > { %p826_p10 = pnand %p825_p4, %p821_p11 }
 0x18c   : > { %829 = shalt.err (!%p826_p10)
}
 0x18d   : > { %642 = dma.vmem_to_hbm [thread:$0]  (%p1046_p0), %s1135_s13, 128, %s1133_s29, %s1141_s8  }
 0x18e   : > { %s441_s11 = scalar_lea.hbm %s1214_s5, %s1094_s26  ;;  %v387_v11 = vpop.permute.xlu0 %386  ;;  %s830_s21 = scalar_lea.vmem %s444_s1, 128 }
 0x18f   : > { %389 = vst.msk [vmem:[%s293_s14] sm:$0xff] %vm306_vm1, %v387_v11  ;;  %p831_p12 = scmp.ne.s32.totalorder %s444_s1, %s830_s21  ;;  %s930_s25 = smov [#allocation10]  }
 0x190   : > { %s834_s28 = sshll.u32 %s930_s25, 4  ;;  %s835_s28 = int_to_ptr.vmem [resolvable:$false] %s834_s28 }
 0x191   : > { %p832_p3 = pnand %p831_p12, %p1046_p0  ;;  %s836_s9 = scalar_lea.vmem %s835_s28, 256 }
 0x192   : > { %p837_p7 = scmp.lt.s32.totalorder %s444_s1, %s835_s28  ;;  %p838_p2 = scmp.lt.s32.totalorder %s836_s9, %s830_s21 }
 0x193   : > { %p833_p5 = pneg %p832_p3 }
 0x194   : > { %p839_p6 = por %p838_p2, %p837_p7 }
 0x196   : > { %p840_p9 = pnand %p839_p6, %p833_p5 }
 0x198   : > { %843 = shalt.err (!%p840_p9)
}
 0x199   : > { %s844_s26 = scalar_lea.hbm %s441_s11, 128  ;;  %s848_s29 = scalar_lea.hbm %s1214_s5, 256 }
 0x19a   : > { %p845_p13 = scmp.ne.s32.totalorder %s441_s11, %s844_s26  ;;  %p849_p8 = scmp.lt.s32.totalorder %s441_s11, %s1214_s5 }
 0x19b   : > { %p850_p4 = scmp.lt.s32.totalorder %s848_s29, %s844_s26 }
 0x19c   : > { %p846_p11 = pnand %p845_p13, %p1046_p0 }
 0x19d   : > { %p851_p10 = por %p850_p4, %p849_p8 }
 0x19e   : > { %p847_p1 = pneg %p846_p11 }
 0x1a0   : > { %p852_p12 = pnand %p851_p10, %p847_p1 }
 0x1a2   : > { %855 = shalt.err (!%p852_p12)
}
 0x1a3   : > { %643 = dma.vmem_to_hbm [thread:$0]  (%p1046_p0), %s444_s1, 128, %s441_s11, %s1141_s8  }
 0x1a4 PF: > { %s455_s12 = sand.u32 1, %s898_s18   ;;  %p1231_p3 = scmp.ne.s32.totalorder %s1220_s27, 0 }
 0x1a5   : > { %p1232_p5 = scmp.ge.s32.totalorder %s918_s23, 2  ;;  %s456_s16 = scalar_lea.sflag [#allocation4], %s455_s12 }
 0x1a7   : > { %p656_p7 = pnand %p1232_p5, %p1231_p3 }
 0x1a9   : > { %p657_p2 = pneg %p656_p7 }
 0x1ab   : > { %889 = dma.done.wait (%p657_p2), %s456_s16, 128  }
 0x1ac   : > { %891 = vsyncadd (%p657_p2), %s456_s16, 4294967168  ;;  %s1233_s6 = sadd.s32 4294967294, %s918_s23  }
 0x1ad   : > { %s464_s7 = sand.u32 1, %s1233_s6  }
 0x1ae   : > { %s465_s24 = scalar_lea.sflag [#allocation9], %s464_s7 }
 0x1af   : > { %893 = dma.done.wait (%p657_p2), %s465_s24, 256  }
 0x1b0   : > { %895 = vsyncadd (%p657_p2), %s465_s24, 4294967040  ;;  %s26_s23 = sadd.s32 1, %s918_s23   ;;  %s1234_s27 = sld [smem:[#allocation15_spill]] }
 0x1b1   : > { %p23_p0 = scmp.ge.s32.totalorder %s26_s23, 4   ;;  %s1235_s18 = smov %s902_s19 }
 0x1b2   : > { %s1236_s19 = smov %s906_s20  ;;  %s1237_s20 = smov %s1055_s30 }
 0x1b3   : > { %s1238_s21 = smov %s914_s22  ;;  %25 = sbr.rel (!%p23_p0) target bundleno = 11 (0xb), region = 113 }
 0x1b6   : > { %s1239_s22 = smov %s1234_s27 }
 0x1b8   :  { %479 = vsyncpa [#allocation3], 1 }
 0x1b9   :  { %481 = vsyncpa [#allocation3 + $0x1], 1 }
 0x1ba   :  { %482 = vsyncpa [#allocation6], 1 }
 0x1bb   :  { %483 = vsyncpa [#allocation4], 1 }
 0x1bc   :  { %485 = vsyncpa [#allocation4 + $0x1], 1 }
 0x1bd   :  { %486 = vsyncpa [#allocation9], 1 }
 0x1be   :  { %488 = vsyncpa [#allocation9 + $0x1], 1 }

</bundles_post_ra>
